<compile_context>
chip_gen: v6e
topology: v6e:2x2x1
jax: 0.10.0
libtpu: 0.0.40
codegen_flags: <defaults>
</compile_context>

<pallas_src>
import functools
import math

import jax
import jax.numpy as jnp
from jax import lax
from jax.experimental import pallas as pl
from jax.experimental.pallas import tpu as pltpu


# ---------------------------------------------------------------------------
# Pallas kernel: CLS-query attention for a block of heads.
# ---------------------------------------------------------------------------
def _cls_attention_kernel(q_ref, kv_ref, o_ref, *, scale2, t_valid):
    """One grid step: CLS-token attention over an (Hblk,) block of heads.

    q_ref  : (Hblk, 8, C)      CLS query broadcast to 8 sublane-aligned rows
    kv_ref : (2, Hblk, C, Tp)  K = kv_ref[0], V = kv_ref[1]; Tp % 128 == 0
    o_ref  : (Hblk, C)         attended CLS features
    Columns >= t_valid of K/V are padding and are masked out of the softmax.
    """
    hblk, _eight, ch = q_ref.shape
    tp = kv_ref.shape[-1]

    # Fold both 1/ch**0.25 factors into one multiply on the (tiny) q block;
    # MXU operands stay in the source dtype (bf16 inputs would stay bf16).
    q = q_ref[...] * scale2                      # (Hblk, 8, C)
    k = kv_ref[0]                                # (Hblk, C, Tp)
    v = kv_ref[1]                                # (Hblk, C, Tp)

    # s[h, m, t] = sum_c q[h, m, c] * k[h, c, t]   (contract C, batch heads)
    s = lax.dot_general(q, k, (((2,), (1,)), ((0,), (0,))),
                        preferred_element_type=jnp.float32)   # (Hblk, 8, Tp)

    if t_valid < tp:                             # static Python branch
        col = lax.broadcasted_iota(jnp.int32, (1, 1, tp), 2)
        s = jnp.where(col < t_valid, s, -jnp.inf)

    # Softmax over keys, in float32 (matches the PyTorch module).
    s_max = jnp.max(s, axis=-1, keepdims=True)
    s_exp = jnp.exp(s - s_max)
    denom = jnp.sum(s_exp, axis=-1, keepdims=True)
    # approx=True reciprocal (~2^-12 rel err) is borderline vs the 1e-3 test
    # tolerance, so keep the exact one (still a single op, off the VALU).
    p = (s_exp * pl.reciprocal(denom, approx=False)).astype(v.dtype)

    # a[h, m, c] = sum_t p[h, m, t] * v[h, c, t]   (contract keys, batch heads)
    a = lax.dot_general(p, v, (((2,), (2,)), ((0,), (0,))),
                        preferred_element_type=jnp.float32)   # (Hblk, 8, C)

    # All 8 query rows are identical (broadcast CLS query); store row 0.
    o_ref[...] = a[:, 0, :].astype(o_ref.dtype)
    # TODO(synk): for very large Tp where even a single-head (2, C, Tp) KV
    # block exceeds the VMEM budget, add a trailing "arbitrary" KV grid axis
    # with f32 m/l/acc scratch (flash-style online softmax).


def _vmem_capacity_bytes():
    """Physical VMEM of the current TPU generation (fallback: v7x's 64 MiB)."""
    try:
        cap = getattr(pltpu.get_tpu_info(), "vmem_capacity_bytes", None)
        if cap:
            return int(cap)
    except Exception:
        pass
    return 64 * 1024 * 1024


def _pick_heads_per_block(num_heads, ch, tp, itemsize, bs, budget_bytes):
    """Largest divisor of num_heads whose per-step working set (double-buffered
    q / kv / out blocks + live f32 intermediates) fits the VMEM budget.

    Valid choices keep the out-spec's second-to-last block dim legal
    (hblk == num_heads or hblk % 8 == 0) and, when possible, expose >= 2
    parallel grid steps so v7x's two TensorCores both get work.
    """
    def bytes_needed(hb):
        kv_io = 2 * 2 * hb * ch * tp * itemsize          # kv block, double-buffered
        q_io = 2 * hb * 8 * max(ch, 128) * itemsize      # q block (lane-padded)
        o_io = 2 * hb * 8 * 128 * itemsize               # out block (tile-padded)
        tmp = 3 * hb * 8 * tp * 4                        # s / exp / p rows (f32)
        tmp += 2 * hb * ch * tp * 4                      # staged k/v operands headroom
        return kv_io + q_io + o_io + tmp

    valid = [hb for hb in range(1, num_heads + 1)
             if num_heads % hb == 0 and (hb == num_heads or hb % 8 == 0)]
    best = valid[0]
    for hb in valid:                                     # ascending -> largest fit wins
        if bytes_needed(hb) <= budget_bytes:
            best = hb
    if bs * (num_heads // best) < 2:                     # v7x megacore: >= 2 steps
        smaller = [hb for hb in valid if hb < best and bytes_needed(hb) <= budget_bytes]
        if smaller:
            best = max(smaller)
    return best


def _cls_attention(q8, kv, t_valid):
    """q8: (B, H, C->..., 8, C) broadcast CLS query; kv: (B, 2, H, C, Tp).

    Returns the attended CLS features, shape (B, H, C).
    """
    bs, num_heads, _eight, ch = q8.shape
    _, two, _, _, tp = kv.shape
    assert two == 2 and tp % 128 == 0
    scale2 = 1.0 / math.sqrt(ch)                 # == (ch**-0.25)**2, applied once

    vmem_cap = _vmem_capacity_bytes()
    vmem_limit = min(vmem_cap * 3 // 4, 96 * 1024 * 1024)   # ~48 MiB v7x, ~96 MiB v5e/v6e
    budget = vmem_limit // 2
    hblk = _pick_heads_per_block(num_heads, ch, tp, kv.dtype.itemsize, bs, budget)
    grid = (bs, num_heads // hblk)

    kernel = functools.partial(_cls_attention_kernel, scale2=scale2, t_valid=t_valid)
    return pl.pallas_call(
        kernel,
        out_shape=jax.ShapeDtypeStruct((bs, num_heads, ch), kv.dtype),
        grid_spec=pltpu.PrefetchScalarGridSpec(
            num_scalar_prefetch=0,
            grid=grid,
            in_specs=[
                # Leading None dims are squeezed out of the kernel views.
                pl.BlockSpec((None, hblk, 8, ch), lambda b, h: (b, h, 0, 0)),
                pl.BlockSpec((None, 2, hblk, ch, tp), lambda b, h: (b, 0, h, 0, 0)),
            ],
            out_specs=pl.BlockSpec((None, hblk, ch), lambda b, h: (b, h, 0)),
        ),
        compiler_params=pltpu.CompilerParams(
            dimension_semantics=("parallel", "parallel"),
            vmem_limit_bytes=vmem_limit,
        ),
    )(q8, kv)


# ---------------------------------------------------------------------------
# AttentionPool2d forward (glue in plain JAX, attention in Pallas).
# ---------------------------------------------------------------------------
def attention_pool_2d(x, pos_emb, qkv_w, qkv_b, c_w, c_b, *, num_heads):
    """x: (B, C, H, W) -> (B, Dout). Matches AttentionPool2d.forward."""
    b, c, h, w = x.shape
    t = h * w + 1
    ch = c // num_heads
    # HIGHEST keeps exact parity with the f32 reference at test tolerance; for
    # production bf16 activations drop it to keep the fast MXU path.
    hp = lax.Precision.HIGHEST

    xf = x.reshape(b, c, h * w)
    xc = jnp.concatenate([jnp.mean(xf, axis=-1, keepdims=True), xf], axis=-1)
    xc = xc + pos_emb[None].astype(xc.dtype)                       # (B, C, T)

    w3 = qkv_w[:, :, 0].reshape(3, num_heads, ch, c)
    b3 = qkv_b.reshape(3, num_heads, ch)

    # Only the CLS query (position 0) is ever consumed downstream: project q
    # for that single column and broadcast it to 8 sublane-aligned rows.
    q0 = jnp.einsum('hco,bo->bhc', w3[0], xc[:, :, 0], precision=hp) + b3[0][None]
    q8 = jnp.broadcast_to(q0[:, :, None, :], (b, num_heads, 8, ch))  # (B, H, 8, C)

    # Pad the sequence to a lane-dense multiple of 128 *before* the K/V
    # projection so kv is produced already padded and never re-copied.
    tp = ((t + 127) // 128) * 128
    xc_p = jnp.pad(xc, ((0, 0), (0, 0), (0, tp - t))) if tp != t else xc
    kv = jnp.einsum('shco,bot->bshct', w3[1:], xc_p, precision=hp) \
        + b3[1:][None, :, :, :, None]                              # (B, 2, H, C, Tp)

    cls = _cls_attention(q8, kv, t_valid=t)                        # (B, H, C)
    cls = cls.reshape(b, num_heads * ch)                           # (B, C)

    # c_proj is pointwise over positions; only the CLS column is needed.
    return jnp.einsum('oc,bc->bo', c_w[:, :, 0], cls, precision=hp) + c_b[None, :]


# ---------------------------------------------------------------------------
# Pure-JAX reference (mirrors the PyTorch code exactly).
# ---------------------------------------------------------------------------
def _attention_pool_2d_reference(x, pos_emb, qkv_w, qkv_b, c_w, c_b, num_heads):
    hp = lax.Precision.HIGHEST
    b, c, *_spatial = x.shape
    xf = x.reshape(b, c, -1)
    xc = jnp.concatenate([jnp.mean(xf, axis=-1, keepdims=True), xf], axis=-1)
    xc = xc + pos_emb[None].astype(xc.dtype)
    qkv = jnp.einsum('oc,bct->bot', qkv_w[:, :, 0], xc, precision=hp) \
        + qkv_b[None, :, None]

    bs, width, length = qkv.shape
    ch = width // (3 * num_heads)
    q, k, v = jnp.split(qkv, 3, axis=1)
    q = q.reshape(bs * num_heads, ch, length)
    k = k.reshape(bs * num_heads, ch, length)
    v = v.reshape(bs * num_heads, ch, length)
    scale = 1.0 / math.sqrt(math.sqrt(ch))
    wgt = jnp.einsum('bct,bcs->bts', q * scale, k * scale, precision=hp)
    wgt = jax.nn.softmax(wgt.astype(jnp.float32), axis=-1).astype(wgt.dtype)
    a = jnp.einsum('bts,bcs->bct', wgt, v, precision=hp).reshape(bs, -1, length)
    out = jnp.einsum('oc,bct->bot', c_w[:, :, 0], a, precision=hp) \
        + c_b[None, :, None]
    return out[:, :, 0]


if __name__ == "__main__":
    # Small AttentionPool2d config: embed_dim=64, 8x8 feature map (T = 65),
    # num_heads_channels=32 -> 2 heads, output_dim=32.
    batch, embed_dim, spacial_dim = 2, 64, 8
    num_heads_channels, output_dim = 32, 32
    num_heads = embed_dim // num_heads_channels

    key = jax.random.PRNGKey(0)
    kx, kp, kqw, kqb, kcw, kcb = jax.random.split(key, 6)
    x = jax.random.normal(kx, (batch, embed_dim, spacial_dim, spacial_dim),
                          jnp.float32)
    pos_emb = (jax.random.normal(kp, (embed_dim, spacial_dim ** 2 + 1),
                                 jnp.float32) / embed_dim ** 0.5)
    qkv_w = (jax.random.normal(kqw, (3 * embed_dim, embed_dim, 1), jnp.float32)
             / math.sqrt(embed_dim))
    qkv_b = 0.02 * jax.random.normal(kqb, (3 * embed_dim,), jnp.float32)
    c_w = (jax.random.normal(kcw, (output_dim, embed_dim, 1), jnp.float32)
           / math.sqrt(embed_dim))
    c_b = 0.02 * jax.random.normal(kcb, (output_dim,), jnp.float32)

    fwd = jax.jit(functools.partial(attention_pool_2d, num_heads=num_heads))
    out = jax.block_until_ready(fwd(x, pos_emb, qkv_w, qkv_b, c_w, c_b))

    ref = _attention_pool_2d_reference(x, pos_emb, qkv_w, qkv_b, c_w, c_b,
                                       num_heads)
    assert out.shape == (batch, output_dim)
    max_diff = float(jnp.max(jnp.abs(out - ref)))
    assert max_diff < 1e-3, f"max abs diff vs reference: {max_diff}"
    print("KERNEL_OK")
</pallas_src>

<mosaic_0001>
module attributes {stable_mosaic.version = 11 : i64} {
  func.func @_cls_attention_kernel(%arg0: i32, %arg1: i32, %arg2: memref<1x2x8x32xf32, #tpu.memory_space<vmem>>, %arg3: memref<1x2x2x32x128xf32, #tpu.memory_space<vmem>>, %arg4: memref<1x2x32xf32, #tpu.memory_space<vmem>>) attributes {dimension_semantics = [#tpu.dimension_semantics<parallel>, #tpu.dimension_semantics<parallel>], iteration_bounds = array<i64: 2, 1>, scalar_prefetch = 0 : i64, scratch_operands = 0 : i64, tpu.core_type = #tpu.core_type<tc>, window_params = [{transform_indices = @transform_0, window_bounds = array<i64: 1, 2, 8, 32>}, {transform_indices = @transform_1, window_bounds = array<i64: 1, 2, 2, 32, 128>}, {transform_indices = @transform_2, window_bounds = array<i64: 1, 2, 32>}]} {
    %c0 = arith.constant 0 : index
    %c0_0 = arith.constant 0 : index
    %c0_1 = arith.constant 0 : index
    %c0_2 = arith.constant 0 : index
    %0 = vector.load %arg2[%c0, %c0_0, %c0_1, %c0_2] : memref<1x2x8x32xf32, #tpu.memory_space<vmem>>, vector<1x2x8x32xf32>
    %1 = vector.shape_cast %0 : vector<1x2x8x32xf32> to vector<2x8x32xf32>
    %cst = arith.constant 0.176776692 : f32
    %2 = vector.broadcast %cst : f32 to vector<2x8x32xf32>
    %3 = arith.mulf %1, %2 : vector<2x8x32xf32>
    %c0_3 = arith.constant 0 : index
    %c0_4 = arith.constant 0 : index
    %c0_5 = arith.constant 0 : index
    %c0_6 = arith.constant 0 : index
    %c0_7 = arith.constant 0 : index
    %4 = vector.load %arg3[%c0_3, %c0_4, %c0_5, %c0_6, %c0_7] : memref<1x2x2x32x128xf32, #tpu.memory_space<vmem>>, vector<1x1x2x32x128xf32>
    %5 = vector.shape_cast %4 : vector<1x1x2x32x128xf32> to vector<2x32x128xf32>
    %c0_8 = arith.constant 0 : index
    %c1 = arith.constant 1 : index
    %c0_9 = arith.constant 0 : index
    %c0_10 = arith.constant 0 : index
    %c0_11 = arith.constant 0 : index
    %6 = vector.load %arg3[%c0_8, %c1, %c0_9, %c0_10, %c0_11] : memref<1x2x2x32x128xf32, #tpu.memory_space<vmem>>, vector<1x1x2x32x128xf32>
    %7 = vector.shape_cast %6 : vector<1x1x2x32x128xf32> to vector<2x32x128xf32>
    %cst_12 = arith.constant dense<0.000000e+00> : vector<2x8x128xf32>
    %8 = tpu.matmul %3, %5, %cst_12 {dimension_numbers = #tpu.dot_dimension_numbers<[2], [1], [1], [2], [0, 0, 0, 1, 1, 2], [0], [0]>} : vector<2x8x32xf32>, vector<2x32x128xf32>, vector<2x8x128xf32> -> vector<2x8x128xf32>
    %9 = tpu.iota {dimensions = array<i32: 2>} : vector<1x1x128xi32>
    %c65_i32 = arith.constant 65 : i32
    %10 = vector.broadcast %c65_i32 : i32 to vector<1x1x128xi32>
    %11 = arith.cmpi slt, %9, %10 : vector<1x1x128xi32>
    %cst_13 = arith.constant 0xFF800000 : f32
    %12 = vector.shape_cast %11 : vector<1x1x128xi1> to vector<1x1x128xi1>
    %13 = vector.broadcast %12 : vector<1x1x128xi1> to vector<2x8x128xi1>
    %14 = vector.broadcast %cst_13 : f32 to vector<2x8x128xf32>
    %15 = arith.select %13, %8, %14 : vector<2x8x128xi1>, vector<2x8x128xf32>
    %cst_14 = arith.constant dense<0xFF800000> : vector<2x8xf32>
    %16 = vector.multi_reduction <maximumf>, %15, %cst_14 [2] : vector<2x8x128xf32> to vector<2x8xf32>
    %17 = vector.shape_cast %16 : vector<2x8xf32> to vector<2x8x1xf32>
    %18 = vector.broadcast %17 : vector<2x8x1xf32> to vector<2x8x128xf32>
    %19 = arith.subf %15, %18 : vector<2x8x128xf32>
    %20 = math.exp %19 : vector<2x8x128xf32>
    %cst_15 = arith.constant dense<0.000000e+00> : vector<2x8xf32>
    %21 = vector.multi_reduction <add>, %20, %cst_15 [2] : vector<2x8x128xf32> to vector<2x8xf32>
    %22 = vector.shape_cast %21 : vector<2x8xf32> to vector<2x8x1xf32>
    %23 = tpu.reciprocal %22 : vector<2x8x1xf32> -> vector<2x8x1xf32>
    %24 = vector.broadcast %23 : vector<2x8x1xf32> to vector<2x8x128xf32>
    %25 = arith.mulf %20, %24 : vector<2x8x128xf32>
    %cst_16 = arith.constant dense<0.000000e+00> : vector<2x8x32xf32>
    %26 = tpu.matmul %25, %7, %cst_16 {dimension_numbers = #tpu.dot_dimension_numbers<[2], [2], [1], [1], [0, 0, 0, 1, 1, 1], [0], [0]>} : vector<2x8x128xf32>, vector<2x32x128xf32>, vector<2x8x32xf32> -> vector<2x8x32xf32>
    %27 = vector.extract_strided_slice %26 {offsets = [0, 0, 0], sizes = [2, 1, 32], strides = [1, 1, 1]} : vector<2x8x32xf32> to vector<2x1x32xf32>
    %28 = vector.shape_cast %27 : vector<2x1x32xf32> to vector<2x32xf32>
    %c0_17 = arith.constant 0 : index
    %c0_18 = arith.constant 0 : index
    %c0_19 = arith.constant 0 : index
    %29 = vector.load %arg4[%c0_17, %c0_18, %c0_19] : memref<1x2x32xf32, #tpu.memory_space<vmem>>, vector<1x2x32xf32>
    %30 = vector.shape_cast %29 : vector<1x2x32xf32> to vector<2x32xf32>
    %31 = vector.shape_cast %28 : vector<2x32xf32> to vector<1x2x32xf32>
    tpu.vector_store %arg4[%c0_17, %c0_18, %c0_19], %31 {strides = array<i32>} : memref<1x2x32xf32, #tpu.memory_space<vmem>>, vector<1x2x32xf32>,
    return
  }
  func.func @transform_0(%arg0: i32, %arg1: i32) -> (i32, i32, i32, i32) {
    %c0_i32 = arith.constant 0 : i32
    %c0_i32_0 = arith.constant 0 : i32
    %c0_i32_1 = arith.constant 0 : i32
    return %arg0, %arg1, %c0_i32, %c0_i32_0 : i32, i32, i32, i32
  }
  func.func @transform_1(%arg0: i32, %arg1: i32) -> (i32, i32, i32, i32, i32) {
    %c0_i32 = arith.constant 0 : i32
    %c0_i32_0 = arith.constant 0 : i32
    %c0_i32_1 = arith.constant 0 : i32
    %c0_i32_2 = arith.constant 0 : i32
    return %arg0, %c0_i32, %arg1, %c0_i32_0, %c0_i32_1 : i32, i32, i32, i32, i32
  }
  func.func @transform_2(%arg0: i32, %arg1: i32) -> (i32, i32, i32) {
    %c0_i32 = arith.constant 0 : i32
    %c0_i32_0 = arith.constant 0 : i32
    return %arg0, %arg1, %c0_i32 : i32, i32, i32
  }
}

</mosaic_0001>

<bundles_post_ra>
// kernel: attention_pool_2d.1
= control target key start
LH: loop header
LB: loop body
LE: loop exit
PB: predicated region body
PF: predicated region fallthrough
CT: control target
= control target key end

     0   :  { %s819_s9 = smov 0   ;;  %s821_s10 = smov 0   ;;  %s902_s0 = inlined_call_operand.vmem [shape: f32[2,2,8,32], index: 0, kind: input, shape index: {}]   ;;  %s903_s1 = inlined_call_operand.vmem [shape: f32[2,2,2,32,128], index: 1, kind: input, shape index: {}]   ;;  %s904_s2 = inlined_call_operand.vmem [shape: f32[2,2,32], index: 2, kind: output, shape index: {}]  }
   0x1   :  { %s823_s11 = smov 0  }
   0x2 LB: > { %s24_s12 = sadd.s32 1, %s796_s10  ;;  %p660_p0 = scmp.ge.s32.totalorder %s800_s11, 1  ;;  %s800_s11 = sphi %s823_s11, %s12_s11   ;;  %s796_s10 = sphi %s821_s10, %s906_s10   ;;  %s792_s9 = sphi %s819_s9, %s905_s9  }
   0x3   : > { %p26_p1 = scmp.ge.s32.totalorder %s24_s12, 2  ;;  %p151_p2 = scmp.lt.s32.totalorder %s800_s11, 3 }
   0x5   : > { %s908_s12 = smov (%p26_p1, %s24_s12), 0  ;;  %p152_p3 = pnand %p660_p0, %p151_p2 }
   0x6   : > { %p190_p4 = scmp.lt.s32.totalorder (!%p152_p3), %s792_s9, 1 }
   0x7   : > { %155 = sbr.rel (%p152_p3) target bundleno = 726 (0x2d6), region = 28 }
   0xc   : > { %v802_v0 = vmov 0.0   ;;  %s910_s9 = smov (!%p190_p4, %s792_s9), 1  ;;  %vm803_vm0 = vmmov 0   ;;  %vm238_vm1 = vcmask 261120   ;;  %v385_v13 = vlaneseq }
   0xd   : > { %711 = vmatprep.subr.mxu1 %v802_v0  ;;  %700 = vmatprep.subr.mxu0 %v802_v0  ;;  %s679_s13 = sshll.u32 %s910_s9, 7  ;;  %s678_s14 = sshll.u32 %s910_s9, 4  ;;  %vm553_vm3 = vcmask 1041409   ;;  %vm556_vm4 = vcmask 254976  }
   0xe   : > { %719 = vmatprep.mubr.msk.f32.mxu1 %vm803_vm0, %v802_v0  ;;  %708 = vmatprep.mubr.msk.f32.mxu0 %vm803_vm0, %v802_v0  ;;  %s850_s17 = scalar_lea.vmem %s903_s1, %s679_s13  ;;  %s197_s20 = scalar_lea.vmem %s902_s0, %s678_s14  ;;  %v386_v14 = vand.u32 127, %v385_v13 }
   0xf   : > { %v228_v1 = vld [vmem:[%s850_s17 + $0x38] sm:$0xff]  ;;  %v227_v3 = vld [vmem:[%s850_s17 + $0x30] sm:$0xff]  ;;  %v226_v5 = vld [vmem:[%s850_s17 + $0x28] sm:$0xff]  ;;  %s665_s21 = sshll.u32 %s910_s9, 1 }
  0x10   : > { %v224_v2 = vld [vmem:[%s850_s17 + $0x18] sm:$0xff]  ;;  %712 = vmatpush3.msra.mxu1 %v228_v1  ;;  %v223_v4 = vld [vmem:[%s850_s17 + $0x10] sm:$0xff]  ;;  %v222_v6 = vld [vmem:[%s850_s17 + $0x8] sm:$0xff]  ;;  %vm387_vm2 = vcmp.lt.s32.totalorder %v386_v14, 65  ;;  %s216_s24 = scalar_lea.vmem %s904_s2, %s665_s21 }
  0x11   : > { %701 = vmatpush3.msra.mxu0 %v224_v2  ;;  %713 = vmatprep.subr.mxu1 %v802_v0  ;;  %v218_v7 = vld [vmem:[%s197_s20 + $0x8] sm:$0xff]  ;;  %v217_v8 = vld [vmem:[%s197_s20] sm:$0xff]  ;;  %v673_v29 = vld [vmem:[%s850_s17 + $0x78] sm:$0xff] }
  0x12   : > { %702 = vmatprep.subr.mxu0 %v802_v0  ;;  %714 = vmatpush3.msra.mxu1 %v227_v3  ;;  %v225_v9 = vld [vmem:[%s850_s17 + $0x20] sm:$0xff]  ;;  %v220_v10 = vmul.f32 0.17677669, %v218_v7  ;;  %v219_v12 = vmul.f32 0.17677669, %v217_v8  ;;  %v669_v30 = vld [vmem:[%s850_s17 + $0x58] sm:$0xff] }
  0x13   : > { %703 = vmatpush3.msra.mxu0 %v223_v4  ;;  %715 = vmatprep.subr.mxu1 %v802_v0  ;;  %v221_v11 = vld [vmem:[%s850_s17] sm:$0xff]  ;;  %v672_v31 = vld [vmem:[%s850_s17 + $0x70] sm:$0xff]  ;;  %v671_v33 = vld [vmem:[%s850_s17 + $0x68] sm:$0xff] }
  0x14   : > { %704 = vmatprep.subr.mxu0 %v802_v0  ;;  %716 = vmatpush3.msra.mxu1 %v226_v5  ;;  %v668_v32 = vld [vmem:[%s850_s17 + $0x50] sm:$0xff]  ;;  %v667_v34 = vld [vmem:[%s850_s17 + $0x48] sm:$0xff]  ;;  %v670_v35 = vld [vmem:[%s850_s17 + $0x60] sm:$0xff] }
  0x15   : > { %705 = vmatpush3.msra.mxu0 %v222_v6  ;;  %717 = vmatprep.subr.mxu1 %v802_v0  ;;  %v666_v36 = vld [vmem:[%s850_s17 + $0x40] sm:$0xff] }
  0x16   : > { %706 = vmatprep.subr.mxu0 %v802_v0  ;;  %718 = vmatpush3.msra.mxu1 %v225_v9 }
  0x17   : > { %707 = vmatpush3.msra.mxu0 %v221_v11  ;;  %720 = vmatmul.mubr.msk.f32.vlgmr.msra.gmra.mxu1 %vm238_vm1, %v220_v10 }
  0x18   : > { %709 = vmatmul.mubr.msk.f32.vlgmr.msra.gmra.mxu0 %vm238_vm1, %v219_v12  ;;  %733 = vmatprep.subr.mxu1 %v802_v0 }
  0x19   : > { %722 = vmatprep.subr.mxu0 %v802_v0  ;;  %741 = vmatprep.mubr.msk.f32.mxu1 %vm803_vm0, %v802_v0 }
  0x1a   : > { %730 = vmatprep.mubr.msk.f32.mxu0 %vm803_vm0, %v802_v0  ;;  %734 = vmatpush3.xpose.msra.mxu1 %v673_v29 }
  0x1b   : > { %735 = vmatprep.subr.mxu1 %v802_v0  ;;  %723 = vmatpush3.xpose.msra.mxu0 %v669_v30 }
  0x1c   : > { %724 = vmatprep.subr.mxu0 %v802_v0 }
  0x1e   : > { %736 = vmatpush3.xpose.msra.mxu1 %v672_v31 }
  0x1f   : > { %737 = vmatprep.subr.mxu1 %v802_v0  ;;  %725 = vmatpush3.xpose.msra.mxu0 %v668_v32 }
  0x20   : > { %726 = vmatprep.subr.mxu0 %v802_v0 }
  0x22   : > { %738 = vmatpush3.xpose.msra.mxu1 %v671_v33 }
  0x23   : > { %739 = vmatprep.subr.mxu1 %v802_v0  ;;  %727 = vmatpush3.xpose.msra.mxu0 %v667_v34 }
  0x24   : > { %728 = vmatprep.subr.mxu0 %v802_v0 }
  0x26   : > { %740 = vmatpush3.xpose.msra.mxu1 %v670_v35 }
  0x27   : > { %729 = vmatpush3.xpose.msra.mxu0 %v666_v36 }
  0xd7   : > { %v381_v15 = vpop.f32.mrf.mxu1 }
  0xd8   : > { %v308_v16 = vpop.f32.mrf.mxu0  ;;  %v391_v17 = vsel %vm387_vm2, %v381_v15, -inf }
  0xd9   : > { %394 = vmax.xlane.f32.xlu0 %v391_v17  ;;  %v721_v18 = vpop.f32.mrf.mxu1  ;;  %v390_v20 = vsel %vm387_vm2, %v308_v16, -inf }
  0xda   : > { %v710_v19 = vpop.f32.mrf.mxu0 }
  0xdd   : > { %392 = vmax.xlane.f32.xlu0 %v390_v20 }
 0x162   : > { %v395_v21 = vpop.xlane.xlu0 %394 }
 0x163   : > { %v397_v22 = vsub.f32 %v391_v17, %v395_v21 }
 0x165   : > { %v400_v23 = vmul.f32 1.442695, %v397_v22 }
 0x166   : > { %v393_v24 = vpop.xlane.xlu0 %392 }
 0x167   : > { %770 = vpow2.f32 %v400_v23  ;;  %v396_v25 = vsub.f32 %v390_v20, %v393_v24 }
 0x169   : > { %v398_v26 = vmul.f32 1.442695, %v396_v25 }
 0x16b   : > { %772 = vpow2.f32 %v398_v26 }
 0x174   : > { %v771_v27 = vpop.eup %770 }
 0x175   : > { %404 = vadd.xlane.f32.xlu1 %v771_v27 }
 0x178   : > { %v773_v28 = vpop.eup %772 }
 0x179   : > { %402 = vadd.xlane.f32.xlu1 %v773_v28 }
 0x1fe   : > { %v405_v37 = vpop.xlane.xlu1 %404 }
 0x1ff   : > { %774 = vrcp.f32 %v405_v37 }
 0x202   : > { %v403_v38 = vpop.xlane.xlu1 %402 }
 0x203   : > { %776 = vrcp.f32 %v403_v38 }
 0x20c   : > { %v775_v39 = vpop.eup %774 }
 0x20d   : > { %v409_v40 = vmul.f32 %v775_v39, %v771_v27 }
 0x20f   : > { %742 = vmatmul.mubr.f32.vlgmr.msra.gmra.mxu1 %v409_v40 }
 0x210   : > { %v777_v41 = vpop.eup %776 }
 0x211   : > { %v408_v42 = vmul.f32 %v777_v41, %v773_v28 }
 0x213   : > { %731 = vmatmul.mubr.f32.vlgmr.msra.gmra.mxu0 %v408_v42 }
 0x2cf   : > { %v546_v43 = vpop.f32.mrf.mxu1 }
 0x2d0   : > { %v552_v45 = vrot.slane %v546_v43, 7 }
 0x2d1   : > { %v743_v44 = vpop.f32.mrf.mxu1 }
 0x2d3   : > { %v476_v46 = vpop.f32.mrf.mxu0 }
 0x2d4   : > { %v554_v47 = vsel %vm553_vm3, %v552_v45, %v476_v46 }
 0x2d5   : > { %557 = vst.msk [vmem:[%s216_s24] sm:$0x3] %vm556_vm4, %v554_v47  ;;  %v732_v48 = vpop.f32.mrf.mxu0 }
 0x2d6 PF: > { %s12_s11 = sadd.s32 1, %s800_s11   ;;  %s905_s9 = smov %s796_s10 }
 0x2d7   : > { %p9_p5 = scmp.ge.s32.totalorder %s12_s11, 4   ;;  %s906_s10 = smov %s908_s12 }
 0x2d9   :  { %11 = sbr.rel (!%p9_p5) target bundleno = 2 (0x2), region = 62 }

</bundles_post_ra>
